<compile_context>
chip_gen: v7x
topology: tpu7x:2x2x1
jax: 0.10.0
libtpu: 0.0.40
codegen_flags: <defaults>
</compile_context>

<pallas_src>
import functools

import jax
import jax.numpy as jnp
from jax.experimental import pallas as pl
from jax.experimental.pallas import tpu as pltpu


def _round_up(v, m):
    return ((v + m - 1) // m) * m


def fc_net_kernel(x_ref, w1_ref, b1_ref, w2_ref, b2_ref, out_ref, *, o_real, o_softmax):
    # In-kernel bf16 cast of the streamed f32 x tile (no separate HBM cast pass).
    x = x_ref[...].astype(jnp.bfloat16)

    # Layer 1: Linear (bf16 MXU, f32 accumulate) + LeakyReLU (slope 0.01, PyTorch default)
    h = jnp.dot(x, w1_ref[...], preferred_element_type=jnp.float32)
    h = h + b1_ref[...]
    h = jnp.where(h >= 0.0, h, 0.01 * h)

    # Layer 2: Linear into the lane-padded (128-wide) logits slab for the MXU.
    # Padded columns carry bias -1e30 (set in prepare_params), so after exp they are
    # exactly 0 and need no explicit mask.
    logits = jnp.dot(h.astype(jnp.bfloat16), w2_ref[...],
                     preferred_element_type=jnp.float32)
    logits = logits + b2_ref[...]

    # Numerically stable softmax over a narrow slice (real cols + a few -1e30 pads).
    lg = logits[:, :o_softmax]
    m = jnp.max(lg, axis=-1, keepdims=True)
    e = jnp.exp(lg - m)
    denom = jnp.sum(e, axis=-1, keepdims=True)
    probs = e / denom                                   # exact normalization

    # Store only the real output columns (tiny writeback, no post-kernel slice).
    out_ref[...] = probs[:, :o_real].astype(out_ref.dtype)


def prepare_params(w1, b1, w2, b2):
    """One-time parameter prep (hoisted out of the per-call path).

    PyTorch Linear layout in: w1 [H, D_in], b1 [H], w2 [O, H], b2 [O].
    Returns pre-transposed, lane-padded, bf16-cast parameters + the real O.
    Padded b2 entries are -1e30 so the kernel needs no explicit column mask.
    """
    H, _ = w1.shape
    O = w2.shape[0]
    O_pad = _round_up(max(O, 1), 128)                 # lane-dense logits width for MXU

    w1_t = w1.T.astype(jnp.bfloat16)                                     # [D_in, H]
    b1_2d = b1.reshape(1, H).astype(jnp.float32)                         # [1, H]
    w2_t = jnp.zeros((H, O_pad), jnp.bfloat16).at[:, :O].set(
        w2.T.astype(jnp.bfloat16))                                       # [H, O_pad]
    b2_2d = jnp.full((1, O_pad), -1e30, jnp.float32).at[:, :O].set(
        b2.astype(jnp.float32))                                          # [1, O_pad]
    return (w1_t, b1_2d, w2_t, b2_2d), O


def fc_net_forward(x, params, o_real, *, tile_b=2048, vmem_budget_bytes=40 * 2**20):
    """x: [B, D_in] f32 (or bf16). params from prepare_params. Returns probs [B, o_real]."""
    w1_t, b1_2d, w2_t, b2_2d = params
    B, D_in = x.shape
    H = w1_t.shape[1]
    O_pad = w2_t.shape[1]
    o_softmax = min(O_pad, _round_up(o_real, 8))
    x_bytes = jnp.dtype(x.dtype).itemsize

    def vmem_est(tb):
        # Double-buffered x / out DMA tiles + (double-buffered) resident weights
        # + f32/bf16 intermediates (bf16 x copy, h, logits, exp, ...).
        io = 2 * tb * D_in * x_bytes + 2 * tb * o_real * 4
        wts = 2 * (D_in * H * 2 + H * 4 + H * O_pad * 2 + O_pad * 4)
        interm = tb * (D_in * 2 + H * 8 + O_pad * 8)
        return io + wts + interm

    # Batch tiling: tiles are 8-row aligned; when B > 8 use at least 2 grid steps so the
    # "parallel" axis can shard across v7x's two TensorCores; shrink the tile if the
    # estimated working set exceeds the VMEM budget (safe on v7x's 64 MiB part).
    if B <= 8:
        tb = B
    else:
        tb = min(tile_b, max(8, _round_up(pl.cdiv(B, 2), 8)))
        tb = max(8, (tb // 8) * 8)
        while tb > 8 and vmem_est(tb) > vmem_budget_bytes:
            tb = max(8, ((tb // 2) // 8) * 8)
    grid = (pl.cdiv(B, tb),)   # partial last block allowed; OOB rows never written back

    vmem_limit = int(min(60 * 2**20, max(32 * 2**20, vmem_est(tb) * 1.4)))

    cost = pl.CostEstimate(
        flops=2 * B * (D_in * H + H * O_pad),
        transcendentals=B * o_softmax,
        bytes_accessed=(B * D_in * x_bytes + B * o_real * 4
                        + D_in * H * 2 + H * 4 + H * O_pad * 2 + O_pad * 4),
    )

    kernel = functools.partial(fc_net_kernel, o_real=o_real, o_softmax=o_softmax)
    out = pl.pallas_call(
        kernel,
        out_shape=jax.ShapeDtypeStruct((B, o_real), jnp.float32),
        grid_spec=pltpu.PrefetchScalarGridSpec(
            num_scalar_prefetch=0,
            grid=grid,
            in_specs=[
                pl.BlockSpec((tb, D_in), lambda i: (i, 0)),    # x: streamed over batch (f32)
                pl.BlockSpec((D_in, H), lambda i: (0, 0)),     # w1: VMEM-resident
                pl.BlockSpec((1, H), lambda i: (0, 0)),        # b1: VMEM-resident
                pl.BlockSpec((H, O_pad), lambda i: (0, 0)),    # w2 (padded): resident
                pl.BlockSpec((1, O_pad), lambda i: (0, 0)),    # b2 (padded, -1e30): resident
            ],
            out_specs=pl.BlockSpec((tb, o_real), lambda i: (i, 0)),   # narrow writeback
        ),
        compiler_params=pltpu.CompilerParams(
            dimension_semantics=("parallel",),                 # shard batch across TCs (v7x)
            vmem_limit_bytes=vmem_limit),
        cost_estimate=cost,
    )(x, w1_t, b1_2d, w2_t, b2_2d)
    return out


def reference_forward(x, w1, b1, w2, b2):
    """Pure-JAX reference mirroring the kernel's bf16 matmul / f32 accumulate numerics."""
    h = jnp.dot(x.astype(jnp.bfloat16), w1.T.astype(jnp.bfloat16),
                preferred_element_type=jnp.float32) + b1
    h = jnp.where(h >= 0.0, h, 0.01 * h)
    logits = jnp.dot(h.astype(jnp.bfloat16), w2.T.astype(jnp.bfloat16),
                     preferred_element_type=jnp.float32) + b2
    return jax.nn.softmax(logits, axis=1)


if __name__ == "__main__":
    # Small shapes consistent with FC_net(input_dim, hidden_dim=128, out_dim=2)
    D_IN, HID, OUT = 256, 128, 2

    key = jax.random.PRNGKey(0)
    kx, k1, k2, k3, k4, kx2 = jax.random.split(key, 6)

    # PyTorch Linear layout: [out_features, in_features]
    w1 = jax.random.normal(k1, (HID, D_IN), dtype=jnp.float32) * 0.02
    b1 = jax.random.normal(k2, (HID,), dtype=jnp.float32) * 0.02
    w2 = jax.random.normal(k3, (OUT, HID), dtype=jnp.float32) * 0.02
    b2 = jax.random.normal(k4, (OUT,), dtype=jnp.float32) * 0.02

    # One-time parameter prep (transpose / pad / bf16 cast / -1e30 pad bias).
    params, o_real = prepare_params(w1, b1, w2, b2)

    # Case 1: small batch, single grid step.
    x_small = jax.random.normal(kx, (8, D_IN), dtype=jnp.float32)
    out_small = fc_net_forward(x_small, params, o_real)
    jax.block_until_ready(out_small)
    ref_small = reference_forward(x_small, w1, b1, w2, b2)
    assert out_small.shape == (8, OUT)
    assert jnp.allclose(out_small, ref_small, atol=2e-3, rtol=2e-3), "mismatch vs reference"
    assert jnp.allclose(jnp.sum(out_small, axis=1), 1.0, atol=1e-4), "rows must sum to 1"

    # Case 2: non-multiple-of-8 batch -> multi-step grid with a partial last block.
    x_big = jax.random.normal(kx2, (40, D_IN), dtype=jnp.float32)
    out_big = fc_net_forward(x_big, params, o_real)
    jax.block_until_ready(out_big)
    ref_big = reference_forward(x_big, w1, b1, w2, b2)
    assert out_big.shape == (40, OUT)
    assert jnp.allclose(out_big, ref_big, atol=2e-3, rtol=2e-3), "mismatch vs reference"
    assert jnp.allclose(jnp.sum(out_big, axis=1), 1.0, atol=1e-4), "rows must sum to 1"

    print("KERNEL_OK")
</pallas_src>

<mosaic_0001>
module attributes {stable_mosaic.version = 11 : i64} {
  func.func @fc_net_kernel(%arg0: i32, %arg1: memref<8x256xf32, #tpu.memory_space<vmem>>, %arg2: memref<256x128xbf16, #tpu.memory_space<vmem>>, %arg3: memref<1x128xf32, #tpu.memory_space<vmem>>, %arg4: memref<128x128xbf16, #tpu.memory_space<vmem>>, %arg5: memref<1x128xf32, #tpu.memory_space<vmem>>, %arg6: memref<8x2xf32, #tpu.memory_space<vmem>>) attributes {dimension_semantics = [#tpu.dimension_semantics<parallel>], iteration_bounds = array<i64: 1>, scalar_prefetch = 0 : i64, scratch_operands = 0 : i64, tpu.core_type = #tpu.core_type<tc>, window_params = [{transform_indices = @transform_0, window_bounds = array<i64: 8, 256>}, {pipeline_mode = #tpu.pipeline_mode<synchronous>, transform_indices = @transform_1, window_bounds = array<i64: 256, 128>}, {pipeline_mode = #tpu.pipeline_mode<synchronous>, transform_indices = @transform_2, window_bounds = array<i64: 1, 128>}, {pipeline_mode = #tpu.pipeline_mode<synchronous>, transform_indices = @transform_3, window_bounds = array<i64: 128, 128>}, {pipeline_mode = #tpu.pipeline_mode<synchronous>, transform_indices = @transform_4, window_bounds = array<i64: 1, 128>}, {transform_indices = @transform_5, window_bounds = array<i64: 8, 2>}]} {
    %c0 = arith.constant 0 : index
    %c0_0 = arith.constant 0 : index
    %0 = vector.load %arg1[%c0, %c0_0] : memref<8x256xf32, #tpu.memory_space<vmem>>, vector<8x256xf32>
    %1 = arith.truncf %0 : vector<8x256xf32> to vector<8x256xbf16>
    %c0_1 = arith.constant 0 : index
    %c0_2 = arith.constant 0 : index
    %2 = vector.load %arg2[%c0_1, %c0_2] : memref<256x128xbf16, #tpu.memory_space<vmem>>, vector<256x128xbf16>
    %cst = arith.constant dense<0.000000e+00> : vector<8x128xf32>
    %3 = tpu.matmul %1, %2, %cst {dimension_numbers = #tpu.dot_dimension_numbers<[1], [0], [0], [1], [0, 0, 1, 1], [], []>} : vector<8x256xbf16>, vector<256x128xbf16>, vector<8x128xf32> -> vector<8x128xf32>
    %c0_3 = arith.constant 0 : index
    %c0_4 = arith.constant 0 : index
    %4 = vector.load %arg3[%c0_3, %c0_4] : memref<1x128xf32, #tpu.memory_space<vmem>>, vector<1x128xf32>
    %5 = vector.broadcast %4 : vector<1x128xf32> to vector<8x128xf32>
    %6 = arith.addf %3, %5 : vector<8x128xf32>
    %cst_5 = arith.constant 0.000000e+00 : f32
    %7 = vector.broadcast %cst_5 : f32 to vector<8x128xf32>
    %8 = arith.cmpf oge, %6, %7 : vector<8x128xf32>
    %cst_6 = arith.constant 0.00999999977 : f32
    %9 = vector.broadcast %cst_6 : f32 to vector<8x128xf32>
    %10 = arith.mulf %9, %6 : vector<8x128xf32>
    %11 = arith.select %8, %6, %10 : vector<8x128xi1>, vector<8x128xf32>
    %12 = arith.truncf %11 : vector<8x128xf32> to vector<8x128xbf16>
    %c0_7 = arith.constant 0 : index
    %c0_8 = arith.constant 0 : index
    %13 = vector.load %arg4[%c0_7, %c0_8] : memref<128x128xbf16, #tpu.memory_space<vmem>>, vector<128x128xbf16>
    %cst_9 = arith.constant dense<0.000000e+00> : vector<8x128xf32>
    %14 = tpu.matmul %12, %13, %cst_9 {dimension_numbers = #tpu.dot_dimension_numbers<[1], [0], [0], [1], [0, 0, 1, 1], [], []>} : vector<8x128xbf16>, vector<128x128xbf16>, vector<8x128xf32> -> vector<8x128xf32>
    %c0_10 = arith.constant 0 : index
    %c0_11 = arith.constant 0 : index
    %15 = vector.load %arg5[%c0_10, %c0_11] : memref<1x128xf32, #tpu.memory_space<vmem>>, vector<1x128xf32>
    %16 = vector.broadcast %15 : vector<1x128xf32> to vector<8x128xf32>
    %17 = arith.addf %14, %16 : vector<8x128xf32>
    %18 = vector.extract_strided_slice %17 {offsets = [0, 0], sizes = [8, 8], strides = [1, 1]} : vector<8x128xf32> to vector<8x8xf32>
    %cst_12 = arith.constant dense<0xFF800000> : vector<8xf32>
    %19 = vector.multi_reduction <maximumf>, %18, %cst_12 [1] : vector<8x8xf32> to vector<8xf32>
    %20 = vector.shape_cast %19 : vector<8xf32> to vector<8x1xf32>
    %21 = vector.broadcast %20 : vector<8x1xf32> to vector<8x8xf32>
    %22 = arith.subf %18, %21 : vector<8x8xf32>
    %23 = math.exp %22 : vector<8x8xf32>
    %cst_13 = arith.constant dense<0.000000e+00> : vector<8xf32>
    %24 = vector.multi_reduction <add>, %23, %cst_13 [1] : vector<8x8xf32> to vector<8xf32>
    %25 = vector.shape_cast %24 : vector<8xf32> to vector<8x1xf32>
    %26 = vector.broadcast %25 : vector<8x1xf32> to vector<8x8xf32>
    %27 = arith.divf %23, %26 : vector<8x8xf32>
    %28 = vector.extract_strided_slice %27 {offsets = [0, 0], sizes = [8, 2], strides = [1, 1]} : vector<8x8xf32> to vector<8x2xf32>
    %c0_14 = arith.constant 0 : index
    %c0_15 = arith.constant 0 : index
    %29 = vector.load %arg6[%c0_14, %c0_15] : memref<8x2xf32, #tpu.memory_space<vmem>>, vector<8x2xf32>
    tpu.vector_store %arg6[%c0_14, %c0_15], %28 {strides = array<i32>} : memref<8x2xf32, #tpu.memory_space<vmem>>, vector<8x2xf32>,
    return
  }
  func.func @transform_0(%arg0: i32) -> (i32, i32) {
    %c0_i32 = arith.constant 0 : i32
    %c0_i32_0 = arith.constant 0 : i32
    return %arg0, %c0_i32 : i32, i32
  }
  func.func @transform_1(%arg0: i32) -> (i32, i32) {
    %c0_i32 = arith.constant 0 : i32
    %c0_i32_0 = arith.constant 0 : i32
    %c0_i32_1 = arith.constant 0 : i32
    return %c0_i32, %c0_i32_0 : i32, i32
  }
  func.func @transform_2(%arg0: i32) -> (i32, i32) {
    %c0_i32 = arith.constant 0 : i32
    %c0_i32_0 = arith.constant 0 : i32
    %c0_i32_1 = arith.constant 0 : i32
    return %c0_i32, %c0_i32_0 : i32, i32
  }
  func.func @transform_3(%arg0: i32) -> (i32, i32) {
    %c0_i32 = arith.constant 0 : i32
    %c0_i32_0 = arith.constant 0 : i32
    %c0_i32_1 = arith.constant 0 : i32
    return %c0_i32, %c0_i32_0 : i32, i32
  }
  func.func @transform_4(%arg0: i32) -> (i32, i32) {
    %c0_i32 = arith.constant 0 : i32
    %c0_i32_0 = arith.constant 0 : i32
    %c0_i32_1 = arith.constant 0 : i32
    return %c0_i32, %c0_i32_0 : i32, i32
  }
  func.func @transform_5(%arg0: i32) -> (i32, i32) {
    %c0_i32 = arith.constant 0 : i32
    %c0_i32_0 = arith.constant 0 : i32
    return %arg0, %c0_i32 : i32, i32
  }
}

</mosaic_0001>

<bundles_post_ra>
// kernel: tpu_custom_call.1
= control target key start
LH: loop header
LB: loop body
LE: loop exit
PB: predicated region body
PF: predicated region fallthrough
CT: control target
= control target key end

     0   :  { %10 = vsyncpa [#allocation3], 0  ;;  %s653_s0 = inlined_call_operand.hbm [shape: f32[8,256], index: 0, kind: input, shape index: {}]   ;;  %s654_s1 = inlined_call_operand.hbm [shape: bf16[256,128], index: 1, kind: input, shape index: {}]   ;;  %s655_s2 = inlined_call_operand.vmem [shape: f32[1,128], index: 2, kind: input, shape index: {}]   ;;  %s656_s3 = inlined_call_operand.hbm [shape: bf16[128,128], index: 3, kind: input, shape index: {}]   ;;  %s657_s4 = inlined_call_operand.vmem [shape: f32[1,128], index: 4, kind: input, shape index: {}]   ;;  %s658_s5 = inlined_call_operand.vmem [shape: f32[8,2], index: 5, kind: output, shape index: {}]  }
   0x1   :  { %11 = vsyncpa [#allocation5], 0  ;;  %s556_s18 = smov [#allocation4]   ;;  %s486_s22 = scalar_lea.hbm %s654_s1, 2048 }
   0x2   :  { %s27_s19 = sshll.u32 %s556_s18, 4  ;;  %p487_p0 = scmp.ne.s32.totalorder %s654_s1, %s486_s22  ;;  %s28_s19 = int_to_ptr.vmem [resolvable:$true] %s27_s19 }
   0x3   :  { %p490_p1 = scmp.lt.u32.totalorder %s486_s22, %s654_s1 }
   0x5   :  { %p492_p2 = pnand %p490_p1, %p487_p0 }
   0x7   :  { %495 = shalt.err (!%p492_p2)
}
   0x8   :  { %s496_s27 = scalar_lea.vmem %s28_s19, 2048  ;;  %p501_p4 = scmp.lt.s32.totalorder %s28_s19, %s28_s19 }
   0x9   :  { %p497_p3 = scmp.ne.s32.totalorder %s28_s19, %s496_s27  ;;  %p502_p5 = scmp.lt.s32.totalorder %s496_s27, %s496_s27 }
   0xb   :  { %p503_p6 = por %p502_p5, %p501_p4 }
   0xd   :  { %p504_p7 = pnand %p503_p6, %p497_p3 }
   0xf   :  { %507 = shalt.err (!%p504_p7)
}
  0x10   :  { %s557_s28 = smov 64   ;;  %s558_s29 = smov 4  }
  0x11   :  { %33 = dma.hbm_to_vmem [thread:$0]  %s654_s1, 2048, %s28_s19, [#allocation5], %s557_s28, %s557_s28, %s558_s29  }
  0x12   :  { %s559_s7 = smov [#allocation2]   ;;  %s560_s9 = smov [#allocation6]  }
  0x13   :  { %s18_s8 = sshll.u32 %s559_s7, 4  ;;  %s41_s10 = sshll.u32 %s560_s9, 4  ;;  %s19_s8 = int_to_ptr.vmem [resolvable:$true] %s18_s8  ;;  %s42_s10 = int_to_ptr.vmem [resolvable:$true] %s41_s10 }
  0x14   :  { %s508_s13 = scalar_lea.hbm %s653_s0, 256 }
  0x15   :  { %p509_p8 = scmp.ne.s32.totalorder %s653_s0, %s508_s13  ;;  %p512_p9 = scmp.lt.u32.totalorder %s508_s13, %s653_s0 }
  0x17   :  { %p514_p10 = pnand %p512_p9, %p509_p8 }
  0x19   :  { %517 = shalt.err (!%p514_p10)
}
  0x1a   :  { %s518_s1 = scalar_lea.vmem %s19_s8, 256  ;;  %p523_p12 = scmp.lt.s32.totalorder %s19_s8, %s19_s8 }
  0x1b   :  { %p519_p11 = scmp.ne.s32.totalorder %s19_s8, %s518_s1  ;;  %p524_p13 = scmp.lt.s32.totalorder %s518_s1, %s518_s1 }
  0x1d   :  { %p525_p0 = por %p524_p13, %p523_p12 }
  0x1f   :  { %p526_p1 = pnand %p525_p0, %p519_p11 }
  0x21   :  { %529 = shalt.err (!%p526_p1)
}
  0x22   :  { %21 = dma.hbm_to_vmem [thread:$0]  %s653_s0, 256, %s19_s8, [#allocation3]  }
  0x23   :  { %s530_s22 = scalar_lea.hbm %s656_s3, 1024 }
  0x24   :  { %p531_p2 = scmp.ne.s32.totalorder %s656_s3, %s530_s22  ;;  %p534_p3 = scmp.lt.u32.totalorder %s530_s22, %s656_s3 }
  0x26   :  { %p536_p4 = pnand %p534_p3, %p531_p2 }
  0x28   :  { %539 = shalt.err (!%p536_p4)
}
  0x29   :  { %s540_s27 = scalar_lea.vmem %s42_s10, 1024  ;;  %p545_p6 = scmp.lt.s32.totalorder %s42_s10, %s42_s10 }
  0x2a   :  { %p541_p5 = scmp.ne.s32.totalorder %s42_s10, %s540_s27  ;;  %p546_p7 = scmp.lt.s32.totalorder %s540_s27, %s540_s27 }
  0x2c   :  { %p547_p8 = por %p546_p7, %p545_p6 }
  0x2e   :  { %p548_p9 = pnand %p547_p8, %p541_p5 }
  0x30   :  { %551 = shalt.err (!%p548_p9)
}
  0x31   :  { %47 = dma.hbm_to_vmem [thread:$0]  %s656_s3, 1024, %s42_s10, [#allocation5], %s557_s28, %s557_s28, %s558_s29  }
  0x32   :  { %552 = dma.done.wait [#allocation3], 256  }
  0x33   :  { %553 = vsyncadd [#allocation3], 4294967040 }
  0x34   :  { %554 = dma.done.wait [#allocation5], 3072  }
  0x35   :  { %555 = vsyncadd [#allocation5], 4294964224  ;;  %v561_v0 = vmov 0.0   ;;  %v458_v1 = vld [vmem:[#allocation4 + $0x40] sm:$0xff]   ;;  %v460_v3 = vld [vmem:[#allocation4 + $0x48] sm:$0xff]   ;;  %vm562_vm0 = vmmov 0  }
  0x36   :  { %431 = vmatprep.subr.bf16.mxu1 %v561_v0  ;;  %v459_v2 = vld [vmem:[#allocation4] sm:$0xff]   ;;  %400 = vmatprep.subr.bf16.mxu0 %v458_v1  ;;  %v461_v4 = vld [vmem:[#allocation4 + $0x8] sm:$0xff]   ;;  %v462_v5 = vld [vmem:[#allocation4 + $0x50] sm:$0xff]   ;;  %vm354_vm2 = vcmask 64512   ;;  %vm366_vm3 = vcmask 15360  }
  0x37   :  { %401 = vmatpush3.bf16.msra.mxu0 %v459_v2  ;;  %v463_v6 = vld [vmem:[#allocation4 + $0x10] sm:$0xff]   ;;  %v464_v7 = vld [vmem:[#allocation4 + $0x58] sm:$0xff]   ;;  %v466_v9 = vld [vmem:[#allocation4 + $0x60] sm:$0xff]   ;;  %447 = vmatprep.mubr.msk.bf16.mxu1 %vm562_vm0, %v561_v0 }
  0x38   :  { %402 = vmatprep.subr.bf16.mxu0 %v460_v3  ;;  %v465_v8 = vld [vmem:[#allocation4 + $0x18] sm:$0xff]   ;;  %v467_v10 = vld [vmem:[#allocation4 + $0x20] sm:$0xff]   ;;  %v468_v11 = vld [vmem:[#allocation4 + $0x68] sm:$0xff]  }
  0x39   :  { %v61_v12 = vld [vmem:[#allocation2 + $0x8] sm:$0xff]  ;;  %v474_v14 = vld [vmem:[#allocation6] sm:$0xff]   ;;  %v469_v15 = vld [vmem:[#allocation4 + $0x28] sm:$0xff]  }
  0x3a   :  { %v63_v13 = vpack.c.bf16 %v61_v12, %v61_v12  ;;  %v470_v16 = vld [vmem:[#allocation4 + $0x70] sm:$0xff]   ;;  %432 = vmatpush3.bf16.msra.mxu1 %v474_v14  ;;  %v475_v17 = vld [vmem:[#allocation6 + $0x8] sm:$0xff]   ;;  %v472_v19 = vld [vmem:[#allocation4 + $0x78] sm:$0xff]  }
  0x3b   :  { %403 = vmatpush3.bf16.msra.mxu0 %v461_v4  ;;  %433 = vmatprep.subr.bf16.mxu1 %v561_v0  ;;  %v471_v18 = vld [vmem:[#allocation4 + $0x30] sm:$0xff]   ;;  %v473_v21 = vld [vmem:[#allocation4 + $0x38] sm:$0xff]   ;;  %v478_v25 = vld [vmem:[#allocation6 + $0x20] sm:$0xff]  }
  0x3c   :  { %404 = vmatprep.subr.bf16.mxu0 %v462_v5  ;;  %231 = vmatprep.mubr.bf16.mxu0 %v63_v13  ;;  %v476_v20 = vld [vmem:[#allocation6 + $0x10] sm:$0xff]   ;;  %v477_v23 = vld [vmem:[#allocation6 + $0x18] sm:$0xff]   ;;  %v479_v26 = vld [vmem:[#allocation6 + $0x28] sm:$0xff]  }
  0x3d   :  { %v60_v22 = vld [vmem:[#allocation2] sm:$0xff]  ;;  %v481_v28 = vld [vmem:[#allocation6 + $0x38] sm:$0xff]  }
  0x3e   :  { %434 = vmatpush3.bf16.msra.mxu1 %v475_v17  ;;  %v62_v24 = vpack.c.bf16 %v60_v22, %v60_v22  ;;  %v480_v27 = vld [vmem:[#allocation6 + $0x30] sm:$0xff]  }
  0x3f   :  { %405 = vmatpush3.bf16.msra.mxu0 %v463_v6  ;;  %435 = vmatprep.subr.bf16.mxu1 %v561_v0  ;;  %v374_v30 = vld [vmem:[%s655_s2] ss:$0 sm:$0xff] }
  0x40   :  { %406 = vmatprep.subr.bf16.mxu0 %v464_v7  ;;  %v391_v39 = vld [vmem:[%s657_s4] ss:$0 sm:$0xff] }
  0x42   :  { %436 = vmatpush3.bf16.msra.mxu1 %v476_v20 }
  0x43   :  { %407 = vmatpush3.bf16.msra.mxu0 %v465_v8  ;;  %437 = vmatprep.subr.bf16.mxu1 %v561_v0 }
  0x44   :  { %408 = vmatprep.subr.bf16.mxu0 %v466_v9 }
  0x46   :  { %438 = vmatpush3.bf16.msra.mxu1 %v477_v23 }
  0x47   :  { %409 = vmatpush3.bf16.msra.mxu0 %v467_v10  ;;  %439 = vmatprep.subr.bf16.mxu1 %v561_v0 }
  0x48   :  { %410 = vmatprep.subr.bf16.mxu0 %v468_v11 }
  0x4a   :  { %440 = vmatpush3.bf16.msra.mxu1 %v478_v25 }
  0x4b   :  { %411 = vmatpush3.bf16.msra.mxu0 %v469_v15  ;;  %441 = vmatprep.subr.bf16.mxu1 %v561_v0 }
  0x4c   :  { %412 = vmatprep.subr.bf16.mxu0 %v470_v16 }
  0x4e   :  { %442 = vmatpush3.bf16.msra.mxu1 %v479_v26 }
  0x4f   :  { %413 = vmatpush3.bf16.msra.mxu0 %v471_v18  ;;  %443 = vmatprep.subr.bf16.mxu1 %v561_v0 }
  0x50   :  { %414 = vmatprep.subr.bf16.mxu0 %v472_v19 }
  0x52   :  { %444 = vmatpush3.bf16.msra.mxu1 %v480_v27 }
  0x53   :  { %415 = vmatpush3.bf16.msra.mxu0 %v473_v21  ;;  %445 = vmatprep.subr.bf16.mxu1 %v561_v0 }
  0x56   :  { %232 = vmatmul.mubr.bf16.vlgmr.msra.gmra.mrb[0].mxu0 %v62_v24  ;;  %446 = vmatpush3.bf16.msra.mxu1 %v481_v28 }
 0x129   :  { %v416_v29 = vpop.f32.mrb[0].mxu0 }
 0x12a   :  { %v417_v31 = vpop.f32.mrb[1].mxu0 }
 0x12b   :  { %v418_v32 = vadd.f32 %v417_v31, %v416_v29  ;;  %v419_v33 = vpop.f32.mrb[2].mxu0 }
 0x12c   :  { %v420_v34 = vpop.f32.mrb[3].mxu0 }
 0x12d   :  { %v234_v35 = vadd.f32 %v418_v32, %v374_v30 }
 0x12f   :  { %v240_v36 = vmul.f32 0.01, %v234_v35  ;;  %vm239_vm1 = vcmp.ge.f32.partialorder %v234_v35, 0.0 }
 0x131   :  { %v241_v37 = vsel %vm239_vm1, %v234_v35, %v240_v36 }
 0x132   :  { %v242_v38 = vpack.c.bf16 %v241_v37, %v241_v37 }
 0x134   :  { %448 = vmatmul.mubr.bf16.vlgmr.msra.gmra.mrb[0].mxu1 %v242_v38 }
 0x207   :  { %v348_v40 = vpop.f32.mrb[0].mxu1 }
 0x208   :  { %v349_v41 = vadd.f32 %v391_v39, %v348_v40  ;;  %v449_v42 = vpop.f32.mrb[1].mxu1 }
 0x209   :  { %v351_v43 = vpop.f32.mrb[2].mxu1 }
 0x20a   :  { %v450_v44 = vpop.f32.mrb[3].mxu1  ;;  %v355_v45 = vsel %vm354_vm2, %v349_v41, -inf }
 0x20b   :  { %356 = vmax.xlane.f32.xlu0 %v355_v45 }
 0x298   :  { %v357_v46 = vpop.xlane.xlu0 %356 }
 0x299   :  { %v358_v47 = vsub.f32 %v349_v41, %v357_v46 }
 0x29b   :  { %v359_v48 = vmul.f32 1.442695, %v358_v47 }
 0x29d   :  { %482 = vpow2.f32 %v359_v48 }
 0x2a7   :  { %v483_v49 = vpop.eup %482 }
 0x2a8   :  { %v361_v50 = vsel %vm354_vm2, %v483_v49, 0.0 }
 0x2a9   :  { %362 = vadd.xlane.f32.xlu0 %v361_v50 }
 0x336   :  { %v363_v51 = vpop.xlane.xlu0 %362 }
 0x337   :  { %484 = vrcp.f32 %v363_v51 }
 0x341   :  { %v485_v52 = vpop.eup %484 }
 0x342   :  { %v365_v53 = vmul.f32 %v485_v52, %v483_v49 }
 0x344   :  { %367 = vst.msk [vmem:[%s658_s5] sm:$0xff] %vm366_vm3, %v365_v53 }
 0x345   :  { %372 = vsyncpa [#allocation3], 1 }
 0x346   :  { %373 = vsyncpa [#allocation5], 1 }

</bundles_post_ra>
